<compile_context>
chip_gen: v7x
topology: tpu7x:2x2x1
jax: 0.10.0
libtpu: 0.0.40
codegen_flags: <defaults>
</compile_context>

<pallas_src>
import math

import jax
import jax.numpy as jnp
from jax import lax
from jax.experimental import pallas as pl
from jax.experimental.pallas import tpu as pltpu


def _round_up(x, m):
    return (x + m - 1) // m * m


def _vmem_capacity_bytes():
    """Per-TensorCore VMEM capacity (v7x has 64 MiB, v5e/v6e have 128 MiB)."""
    try:
        return int(pltpu.get_tpu_info().vmem_capacity_bytes)
    except Exception:
        pass
    try:
        kind = jax.devices()[0].device_kind.lower()
        if "v7" in kind:
            return 64 << 20
    except Exception:
        pass
    return 128 << 20


def _class_lane_multiple():
    """MXU column width: 256 for v6e/v7x (2x256^2 MXU), 128 for v5e and older."""
    try:
        kind = jax.devices()[0].device_kind.lower()
        if any(v in kind for v in ("v2", "v3", "v4", "v5")):
            return 128
    except Exception:
        pass
    return 256


def prepare_fc_params(weight, bias, *, compute_dtype=jnp.bfloat16, lane_multiple=None):
    """One-time parameter prep (call at model init, NOT per forward step).

    Args:
      weight: (num_class, n_features) f32, PyTorch nn.Linear layout.
      bias:   (num_class,) f32.
    Returns:
      w_kn:  (n_features, c_pad) in compute_dtype  -- canonical (K, N) MXU layout.
      b_row: (1, c_pad) f32.
    """
    num_class, n_features = weight.shape
    if lane_multiple is None:
        lane_multiple = _class_lane_multiple()
    c_pad = _round_up(max(num_class, lane_multiple), lane_multiple)
    w_kn = jnp.pad(weight, ((0, c_pad - num_class), (0, 0))).T.astype(compute_dtype)
    b_row = jnp.pad(bias, (0, c_pad - num_class)).reshape(1, c_pad).astype(jnp.float32)
    return w_kn, b_row


def _fc_kernel(x_ref, w_ref, b_ref, o_ref):
    # x_ref: (TB, F)     streamed per batch-tile grid step (bf16 or f32)
    # w_ref: (F, TC)     resident (or streamed over the class axis); (K, N) layout
    # b_ref: (1, TC)     f32
    # o_ref: (TB, TC)    lane-dense output tile
    x = x_ref[...].astype(w_ref.dtype)
    acc = lax.dot_general(
        x,
        w_ref[...],
        dimension_numbers=(((1,), (0,)), ((), ())),  # contract over n_features (K)
        preferred_element_type=jnp.float32,
    )
    o_ref[...] = (acc + b_ref[...]).astype(o_ref.dtype)


def fc_forward(x, w_kn, b_row, num_class, *, batch_tile=512):
    """Pallas FC forward (eval-mode semantics of the PyTorch FC module).

    Args:
      x:     (batch, n_features). bf16 input is streamed as-is (halves HBM traffic).
      w_kn:  (n_features, c_pad) prepared weight from prepare_fc_params().
      b_row: (1, c_pad) prepared f32 bias.
      num_class: number of valid output columns.
    Returns:
      logits: (batch, num_class) in x.dtype.
    """
    batch, n_features = x.shape
    wf, c_pad = w_kn.shape
    assert wf == n_features
    assert c_pad % 128 == 0 and c_pad >= num_class

    x_itemsize = jnp.dtype(x.dtype).itemsize
    w_itemsize = jnp.dtype(w_kn.dtype).itemsize
    out_dtype = x.dtype
    out_itemsize = jnp.dtype(out_dtype).itemsize

    vmem_cap = _vmem_capacity_bytes()
    budget = int(vmem_cap * 0.75)

    # --- class tile: keep W resident if its DOUBLE-BUFFERED copy fits in ~1/3 of budget.
    w_full_2buf = 2 * c_pad * n_features * w_itemsize
    if w_full_2buf <= budget // 3:
        tc = c_pad
    else:
        per_col_2buf = 2 * n_features * w_itemsize
        tc = (budget // 3 // per_col_2buf) // 128 * 128
        tc = max(128, min(tc, c_pad))

    # --- batch tile: multiple of 8, capped at batch_tile; shrink until VMEM fits.
    tb = min(_round_up(batch_tile, 8), _round_up(batch, 8))

    def _fits(tb_):
        need = (
            2 * tb_ * n_features * x_itemsize   # x (double-buffered)
            + 2 * tb_ * tc * out_itemsize       # out (double-buffered)
            + 2 * tc * n_features * w_itemsize  # W (Pallas double-buffers inputs)
            + 2 * tc * 4                        # bias
        )
        return need <= budget

    while tb > 8 and not _fits(tb):
        tb = _round_up(tb // 2, 8)

    nb = pl.cdiv(batch, tb)
    nc = pl.cdiv(c_pad, tc)
    grid = (nb, nc)  # class axis innermost -> x tile reused across class tiles

    vmem_needed = (
        2 * tb * n_features * x_itemsize
        + 2 * tb * tc * out_itemsize
        + 2 * tc * n_features * w_itemsize
        + 2 * tc * 4
    )
    vmem_limit = int(min(max(vmem_needed + (4 << 20), 16 << 20), budget))

    w_bytes_total = (1 if nc == 1 else nb) * c_pad * n_features * w_itemsize
    cost = pl.CostEstimate(
        flops=2 * batch * n_features * c_pad,
        transcendentals=0,
        bytes_accessed=(
            batch * n_features * x_itemsize   # x (fetched once per batch tile)
            + w_bytes_total                   # weight
            + c_pad * 4                       # bias
            + batch * c_pad * out_itemsize    # out
        ),
    )

    out = pl.pallas_call(
        _fc_kernel,
        out_shape=jax.ShapeDtypeStruct((batch, c_pad), out_dtype),
        grid_spec=pltpu.PrefetchScalarGridSpec(
            num_scalar_prefetch=0,
            grid=grid,
            in_specs=[
                pl.BlockSpec((tb, n_features), lambda i, j: (i, 0)),   # x: streamed over batch
                pl.BlockSpec((n_features, tc), lambda i, j: (0, j)),   # W: (K, N), resident/streamed
                pl.BlockSpec((1, tc), lambda i, j: (0, j)),            # b
            ],
            out_specs=pl.BlockSpec((tb, tc), lambda i, j: (i, j)),
        ),
        compiler_params=pltpu.CompilerParams(
            dimension_semantics=("parallel", "parallel"),
            vmem_limit_bytes=vmem_limit,
        ),
        cost_estimate=cost,
    )(x, w_kn, b_row)

    # Slice off class-lane padding (partial batch tail blocks are masked by Pallas).
    return out[:, :num_class]


def init_fc_params(key, n_features, num_class):
    """Deterministic parameter init mirroring the module's __init__."""
    k_w, k_b = jax.random.split(key)
    # nn.init.normal_(weight, 0, sqrt(2 / num_class))
    weight = jax.random.normal(k_w, (num_class, n_features), jnp.float32) * math.sqrt(
        2.0 / num_class
    )
    # nn.Linear default bias init: U(-1/sqrt(fan_in), 1/sqrt(fan_in))
    bound = 1.0 / math.sqrt(n_features)
    bias = jax.random.uniform(
        k_b, (num_class,), jnp.float32, minval=-bound, maxval=bound
    )
    return weight, bias


if __name__ == "__main__":
    key = jax.random.PRNGKey(0)
    k_x, k_p = jax.random.split(key)

    batch = 8
    n_features = 32
    num_class = 16

    x = jax.random.normal(k_x, (batch, n_features), jnp.float32)
    weight, bias = init_fc_params(k_p, n_features, num_class)

    ref = x @ weight.T + bias  # plain-JAX f32 reference (eval-mode FC)

    # Default path: bf16 MXU operands, f32 accumulation. Prep is done ONCE.
    w_kn_bf16, b_row = prepare_fc_params(weight, bias, compute_dtype=jnp.bfloat16)
    logits = fc_forward(x, w_kn_bf16, b_row, num_class)
    jax.block_until_ready(logits)
    assert logits.shape == (batch, num_class)
    assert jnp.allclose(logits, ref, atol=5e-2, rtol=5e-2)

    # Full-f32 path matches the reference tightly.
    w_kn_f32, b_row_f32 = prepare_fc_params(weight, bias, compute_dtype=jnp.float32)
    logits_f32 = fc_forward(x, w_kn_f32, b_row_f32, num_class)
    jax.block_until_ready(logits_f32)
    assert jnp.allclose(logits_f32, ref, atol=1e-3, rtol=1e-3)

    print("KERNEL_OK")
</pallas_src>

<mosaic_0001>
module attributes {stable_mosaic.version = 11 : i64} {
  func.func @_fc_kernel(%arg0: i32, %arg1: i32, %arg2: memref<8x32xf32, #tpu.memory_space<vmem>>, %arg3: memref<32x256xbf16, #tpu.memory_space<vmem>>, %arg4: memref<1x256xf32, #tpu.memory_space<vmem>>, %arg5: memref<8x256xf32, #tpu.memory_space<vmem>>) attributes {dimension_semantics = [#tpu.dimension_semantics<parallel>, #tpu.dimension_semantics<parallel>], iteration_bounds = array<i64: 1, 1>, scalar_prefetch = 0 : i64, scratch_operands = 0 : i64, tpu.core_type = #tpu.core_type<tc>, window_params = [{transform_indices = @transform_0, window_bounds = array<i64: 8, 32>}, {transform_indices = @transform_1, window_bounds = array<i64: 32, 256>}, {transform_indices = @transform_2, window_bounds = array<i64: 1, 256>}, {transform_indices = @transform_3, window_bounds = array<i64: 8, 256>}]} {
    %c0 = arith.constant 0 : index
    %c0_0 = arith.constant 0 : index
    %0 = vector.load %arg2[%c0, %c0_0] : memref<8x32xf32, #tpu.memory_space<vmem>>, vector<8x32xf32>
    %1 = arith.truncf %0 : vector<8x32xf32> to vector<8x32xbf16>
    %c0_1 = arith.constant 0 : index
    %c0_2 = arith.constant 0 : index
    %2 = vector.load %arg3[%c0_1, %c0_2] : memref<32x256xbf16, #tpu.memory_space<vmem>>, vector<32x256xbf16>
    %cst = arith.constant dense<0.000000e+00> : vector<8x256xf32>
    %3 = tpu.matmul %1, %2, %cst {dimension_numbers = #tpu.dot_dimension_numbers<[1], [0], [0], [1], [0, 0, 1, 1], [], []>} : vector<8x32xbf16>, vector<32x256xbf16>, vector<8x256xf32> -> vector<8x256xf32>
    %c0_3 = arith.constant 0 : index
    %c0_4 = arith.constant 0 : index
    %4 = vector.load %arg4[%c0_3, %c0_4] : memref<1x256xf32, #tpu.memory_space<vmem>>, vector<1x256xf32>
    %5 = vector.broadcast %4 : vector<1x256xf32> to vector<8x256xf32>
    %6 = arith.addf %3, %5 : vector<8x256xf32>
    %c0_5 = arith.constant 0 : index
    %c0_6 = arith.constant 0 : index
    %7 = vector.load %arg5[%c0_5, %c0_6] : memref<8x256xf32, #tpu.memory_space<vmem>>, vector<8x256xf32>
    tpu.vector_store %arg5[%c0_5, %c0_6], %6 {strides = array<i32>} : memref<8x256xf32, #tpu.memory_space<vmem>>, vector<8x256xf32>,
    return
  }
  func.func @transform_0(%arg0: i32, %arg1: i32) -> (i32, i32) {
    %c0_i32 = arith.constant 0 : i32
    %c0_i32_0 = arith.constant 0 : i32
    return %arg0, %c0_i32 : i32, i32
  }
  func.func @transform_1(%arg0: i32, %arg1: i32) -> (i32, i32) {
    %c0_i32 = arith.constant 0 : i32
    %c0_i32_0 = arith.constant 0 : i32
    return %c0_i32, %arg1 : i32, i32
  }
  func.func @transform_2(%arg0: i32, %arg1: i32) -> (i32, i32) {
    %c0_i32 = arith.constant 0 : i32
    %c0_i32_0 = arith.constant 0 : i32
    return %c0_i32, %arg1 : i32, i32
  }
  func.func @transform_3(%arg0: i32, %arg1: i32) -> (i32, i32) {
    %c0_i32 = arith.constant 0 : i32
    return %arg0, %arg1 : i32, i32
  }
}

</mosaic_0001>

<bundles_post_ra>
// kernel: tpu_custom_call.1
= control target key start
LH: loop header
LB: loop body
LE: loop exit
PB: predicated region body
PF: predicated region fallthrough
CT: control target
= control target key end

     0   :  { %8 = vsyncpa [#allocation3], 0  ;;  %s304_s0 = inlined_call_operand.hbm [shape: f32[8,32], index: 0, kind: input, shape index: {}]   ;;  %s305_s1 = inlined_call_operand.hbm [shape: bf16[32,256], index: 1, kind: input, shape index: {}]   ;;  %s306_s2 = inlined_call_operand.vmem [shape: f32[1,256], index: 2, kind: input, shape index: {}]   ;;  %s307_s3 = inlined_call_operand.hbm [shape: f32[8,256], index: 3, kind: output, shape index: {}]  }
   0x1   :  { %9 = vsyncpa [#allocation6], 0 }
   0x2   :  { %10 = vsyncpa [#allocation4], 0  ;;  %s232_s12 = smov [#allocation2]   ;;  %s233_s14 = smov [#allocation5]  }
   0x3   :  { %s17_s13 = sshll.u32 %s232_s12, 4  ;;  %s26_s15 = sshll.u32 %s233_s14, 4  ;;  %s18_s13 = int_to_ptr.vmem [resolvable:$true] %s17_s13  ;;  %s258_s15 = int_to_ptr.vmem [resolvable:$true] %s26_s15 }
   0x4   :  { %s160_s18 = scalar_lea.hbm %s304_s0, 128 }
   0x5   :  { %p161_p0 = scmp.ne.s32.totalorder %s304_s0, %s160_s18  ;;  %p164_p1 = scmp.lt.u32.totalorder %s160_s18, %s304_s0 }
   0x7   :  { %p166_p2 = pnand %p164_p1, %p161_p0 }
   0x9   :  { %169 = shalt.err (!%p166_p2)
}
   0xa   :  { %s170_s23 = scalar_lea.vmem %s18_s13, 128  ;;  %p175_p4 = scmp.lt.s32.totalorder %s18_s13, %s18_s13 }
   0xb   :  { %p171_p3 = scmp.ne.s32.totalorder %s18_s13, %s170_s23  ;;  %p176_p5 = scmp.lt.s32.totalorder %s170_s23, %s170_s23 }
   0xd   :  { %p177_p6 = por %p176_p5, %p175_p4 }
   0xf   :  { %p178_p7 = pnand %p177_p6, %p171_p3 }
  0x11   :  { %181 = shalt.err (!%p178_p7)
}
  0x12   :  { %20 = dma.hbm_to_vmem [thread:$0]  %s304_s0, 128, %s18_s13, [#allocation3]  }
  0x13   :  { %s182_s28 = scalar_lea.hbm %s305_s1, 512 }
  0x14   :  { %p183_p8 = scmp.ne.s32.totalorder %s305_s1, %s182_s28  ;;  %p186_p9 = scmp.lt.u32.totalorder %s182_s28, %s305_s1 }
  0x16   :  { %p188_p10 = pnand %p186_p9, %p183_p8 }
  0x18   :  { %191 = shalt.err (!%p188_p10)
}
  0x19   :  { %s192_s6 = scalar_lea.vmem %s258_s15, 512  ;;  %p197_p12 = scmp.lt.s32.totalorder %s258_s15, %s258_s15 }
  0x1a   :  { %p193_p11 = scmp.ne.s32.totalorder %s258_s15, %s192_s6  ;;  %p198_p13 = scmp.lt.s32.totalorder %s192_s6, %s192_s6 }
  0x1c   :  { %p199_p0 = por %p198_p13, %p197_p12 }
  0x1e   :  { %p200_p1 = pnand %p199_p0, %p193_p11 }
  0x20   :  { %203 = shalt.err (!%p200_p1)
}
  0x21   :  { %s234_s0 = smov 128   ;;  %s235_s7 = smov 8  }
  0x22   :  { %32 = dma.hbm_to_vmem [thread:$0]  %s305_s1, 512, %s258_s15, [#allocation6], %s234_s0, %s234_s0, %s235_s7  }
  0x23   :  { %226 = dma.done.wait [#allocation3], 128  }
  0x24   :  { %227 = vsyncadd [#allocation3], 4294967168 }
  0x25   :  { %228 = dma.done.wait [#allocation6], 512  }
  0x26   :  { %229 = vsyncadd [#allocation6], 4294966784  ;;  %v236_v0 = vmov 0   ;;  %v154_v1 = vld [vmem:[#allocation5 + $0x4] ss:$8 sps:$4 sm:$0xff]   ;;  %v42_v5 = vld [vmem:[#allocation2] sm:$0xff]  ;;  %v50_v7 = vlaneseq }
  0x27   :  { %116 = vmatprep.mubr.bf16.mxu0 %v236_v0  ;;  %v156_v2 = vld [vmem:[#allocation5] ss:$8 sps:$4 sm:$0xff]   ;;  %84 = vmatprep.subr.bf16.mxu0 %v154_v1  ;;  %v157_v3 = vld [vmem:[#allocation5 + $0x14] ss:$8 sps:$4 sm:$0xff]   ;;  %v159_v4 = vld [vmem:[#allocation5 + $0x10] ss:$8 sps:$4 sm:$0xff]   ;;  %v43_v6 = vpack.c.bf16 %v42_v5, %v42_v5 }
  0x28   :  { %85 = vmatpush1.bf16.msra.mxu0 %v156_v2  ;;  %vm80_vm0 = vcmask 261120   ;;  %v51_v8 = vshrl.u32 %v50_v7, 7  ;;  %v48_v10 = vld [vmem:[%s306_s2] sm:$0x3]  ;;  %s237_s11 = smov [#allocation7]  }
  0x29   :  { %86 = vmatprep.subr.bf16.mxu0 %v157_v3  ;;  %s133_s12 = sshll.u32 %s237_s11, 4  ;;  %s134_s12 = int_to_ptr.vmem [resolvable:$true] %s133_s12 }
  0x2a   :  { %v52_v9 = vsub.s32 0, %v51_v8  ;;  %v56_v11 = vsub.s32 1, %v51_v8  ;;  %s204_s13 = scalar_lea.vmem %s134_s12, 256  ;;  %p209_p3 = scmp.lt.s32.totalorder %s134_s12, %s134_s12 }
  0x2b   :  { %p205_p2 = scmp.ne.s32.totalorder %s134_s12, %s204_s13  ;;  %p210_p4 = scmp.lt.s32.totalorder %s204_s13, %s204_s13 }
  0x2c   :  { %87 = vmatpush1.bf16.msra.mxu0 %v159_v4  ;;  %v53_v12 = vrot.slane %v48_v10, %v52_v9  ;;  %v57_v13 = vrot.slane %v48_v10, %v56_v11 }
  0x2d   :  { %p211_p5 = por %p210_p4, %p209_p3 }
  0x2f   :  { %147 = vmatmul.mubr.msk.bf16.vlgmr.msra.gmra.mrb[0].mxu0 %vm80_vm0, %v43_v6  ;;  %p212_p6 = pnand %p211_p5, %p205_p2 }
 0x102   :  { %v118_v14 = vpop.f32.mrb[0].mxu0 }
 0x103   :  { %v119_v15 = vadd.f32 %v118_v14, %v53_v12  ;;  %v120_v16 = vpop.f32.mrb[1].mxu0 }
 0x104   :  { %v121_v17 = vadd.f32 %v120_v16, %v57_v13  ;;  %v122_v18 = vpop.f32.mrb[2].mxu0 }
 0x105   :  { %125 = vst [vmem:[#allocation7] sm:$0xff] %v119_v15  ;;  %v123_v19 = vpop.f32.mrb[3].mxu0 }
 0x106   :  { %126 = vst [vmem:[#allocation7 + $0x8] sm:$0xff] %v121_v17 }
 0x107   :  { %215 = shalt.err (!%p212_p6)
}
 0x108   :  { %s216_s15 = scalar_lea.hbm %s307_s3, 256 }
 0x109   :  { %p217_p7 = scmp.ne.s32.totalorder %s307_s3, %s216_s15  ;;  %p220_p8 = scmp.lt.u32.totalorder %s216_s15, %s307_s3 }
 0x10b   :  { %p222_p9 = pnand %p220_p8, %p217_p7 }
 0x10d   :  { %225 = shalt.err (!%p222_p9)
}
 0x10e   :  { %136 = dma.vmem_to_hbm [thread:$0]  %s134_s12, 256, %s307_s3, [#allocation4]  }
 0x10f   :  { %230 = dma.done.wait [#allocation4], 256  }
 0x110   :  { %231 = vsyncadd [#allocation4], 4294967040 }
 0x111   :  { %140 = vsyncpa [#allocation3], 1 }
 0x112   :  { %141 = vsyncpa [#allocation6], 1 }
 0x113   :  { %142 = vsyncpa [#allocation4], 1 }

</bundles_post_ra>
